<compile_context>
chip_gen: v7x
topology: tpu7x:2x2x1
jax: 0.10.0
libtpu: 0.0.40
codegen_flags: <defaults>
</compile_context>

<pallas_src>
import jax
import jax.numpy as jnp
from jax.experimental import pallas as pl
from jax.experimental.pallas import tpu as pltpu


def hybrid_kernel(xt_ref, w1_ref, b1_ref, dw_ref, db_ref, out_ref):
    # xt_ref : (F, TB)  f32  input tile (x^T), batch lane-dense
    # w1_ref : (8, F)   f32  fc1 weight (nn.Linear layout [out, in]), VMEM-resident
    # b1_ref : (8, 1)   f32  fc1 bias column, resident
    # dw_ref : (1, 8)   f32  W2[1,:] - W2[0,:], resident
    # db_ref : (1, 1)   f32  b2[1] - b2[0]  (SMEM scalar)
    # out_ref: (2, TB)  f32  [log p0 ; log p1], lane-dense
    #
    # NOTE: in the ragged last grid step, lanes beyond the real batch carry garbage;
    # Pallas masks them on the output write, so they never reach HBM.

    # fc1 + bias + ReLU on the MXU (VALU stays free for the rest).
    z = jnp.dot(w1_ref[...], xt_ref[...], preferred_element_type=jnp.float32)  # (8, TB)
    h = jnp.maximum(z + b1_ref[...], 0.0)                                      # (8, TB)

    # Quantum layer (ideal deterministic limit): q_j = +1 iff cos(h_j) < 0 else -1.
    # cos stays on the EUP (its slot is free while HBM/MXU bind).
    sgn = jnp.where(jnp.cos(h) < 0.0, 1.0, -1.0)                               # (8, TB)

    # fc2 collapsed to the logit delta via a second tiny MXU dot.
    d = jnp.dot(dw_ref[...], sgn, preferred_element_type=jnp.float32) + db_ref[0, 0]

    # 2-class log_softmax closed form with a stable softplus (log1p).
    sp = jnp.maximum(d, 0.0) + jnp.log1p(jnp.exp(-jnp.abs(d)))                 # (1, TB)
    out_ref[0:1, :] = (-sp).astype(out_ref.dtype)        # log p0
    out_ref[1:2, :] = (d - sp).astype(out_ref.dtype)     # log p1


def _pick_batch_tile(B, tb_max):
    """Lane-axis batch tile.

    Big enough to amortize the ~0.35 us/step pipeline overhead (MiB-scale per step at
    large B), multiple of 128 when tiling, and >= 2 grid steps when the batch is large
    so both v7x TensorCores get work.  Small batches use one full-extent tile.
    """
    if B <= 1024:
        return B                                    # single full-dim tile
    half = pl.cdiv(pl.cdiv(B, 2), 128) * 128        # >= 2 lane-aligned tiles
    return min(tb_max, half)


def hybrid_forward(x, w1, b1, w2, b2, *, tb_max=65536, class_major=False):
    """x: (B, F) f32.  w1: (8, F), b1: (8,), w2: (2, 8), b2: (2,)  (nn.Linear layouts).

    Returns (B, 2) log-probabilities matching HybridModel.forward, or (2, B) if
    class_major=True (skips the trailing output transpose).
    """
    B, F = x.shape

    tb = _pick_batch_tile(B, tb_max)
    grid = (pl.cdiv(B, tb),)

    # Batch on lanes; no zero-padding (ragged last block is masked by Pallas).
    xt = x.T.astype(jnp.float32)                                  # (F, B)
    b1c = b1.reshape(8, 1).astype(jnp.float32)
    dw = (w2[1, :] - w2[0, :]).reshape(1, 8).astype(jnp.float32)
    db = (b2[1] - b2[0]).reshape(1, 1).astype(jnp.float32)

    cost = pl.CostEstimate(
        flops=2 * B * (8 * F) + 2 * B * 8 + 12 * B,
        transcendentals=10 * B,                                   # 8 cos + exp + log / row
        bytes_accessed=4 * (B * F + 2 * B + 8 * F + 8 + 8 + 1),
    )

    out_t = pl.pallas_call(
        hybrid_kernel,
        out_shape=jax.ShapeDtypeStruct((2, B), jnp.float32),
        grid=grid,
        in_specs=[
            pl.BlockSpec((F, tb), lambda i: (0, i)),              # x^T: streamed per tile
            pl.BlockSpec((8, F), lambda i: (0, 0)),               # w1: resident
            pl.BlockSpec((8, 1), lambda i: (0, 0)),               # b1: resident
            pl.BlockSpec((1, 8), lambda i: (0, 0)),               # w2 row delta: resident
            pl.BlockSpec(memory_space=pltpu.MemorySpace.SMEM),    # b2 delta: SMEM scalar
        ],
        out_specs=pl.BlockSpec((2, tb), lambda i: (0, i)),        # lane-dense output
        compiler_params=pltpu.CompilerParams(
            dimension_semantics=("parallel",),                    # v7x dual-TC sharding
            vmem_limit_bytes=48 * 1024 * 1024,                    # big tiles > 32 MiB scoped default margin
            allow_input_fusion=[True, False, False, False, False],  # let XLA fold x.T in
        ),
        cost_estimate=cost,
    )(xt, w1.astype(jnp.float32), b1c, dw, db)

    if class_major:
        return out_t                                              # (2, B)
    # PyTorch layout (B, 2); costs an extra 2*B*4-byte stream each way.
    return out_t.T


def reference_forward(x, w1, b1, w2, b2):
    """Pure-JAX reference mirroring HybridModel.forward (ideal quantum layer)."""
    hp = jax.lax.Precision.HIGHEST
    h = jnp.maximum(jnp.dot(x, w1.T, precision=hp) + b1, 0.0)
    q = jnp.where(jnp.cos(h) < 0.0, 1.0, -1.0)
    logits = jnp.dot(q, w2.T, precision=hp) + b2
    return jax.nn.log_softmax(logits, axis=1)


def _non_borderline_rows(x, w1, b1, tol=1e-3):
    """Rows where no hidden unit sits numerically on the cos(h)=0 decision boundary.

    On such rows the deterministic quantum-layer limit is insensitive to matmul
    rounding (and is where kernel and reference are guaranteed to agree)."""
    hp = jax.lax.Precision.HIGHEST
    h = jnp.maximum(jnp.dot(x, w1.T, precision=hp) + b1, 0.0)
    return jnp.all(jnp.abs(jnp.cos(h)) > tol, axis=1)


def init_params(key, num_features):
    """Deterministic init matching nn.Linear shapes (uniform(-1/sqrt(fan_in), +))."""
    k1, k2, k3, k4 = jax.random.split(key, 4)
    bound1 = 1.0 / jnp.sqrt(jnp.float32(num_features))
    bound2 = 1.0 / jnp.sqrt(jnp.float32(8))
    w1 = jax.random.uniform(k1, (8, num_features), jnp.float32, -bound1, bound1)
    b1 = jax.random.uniform(k2, (8,), jnp.float32, -bound1, bound1)
    w2 = jax.random.uniform(k3, (2, 8), jnp.float32, -bound2, bound2)
    b2 = jax.random.uniform(k4, (2,), jnp.float32, -bound2, bound2)
    return w1, b1, w2, b2


if __name__ == "__main__":
    key = jax.random.PRNGKey(0)
    kx, kp = jax.random.split(key)

    num_features = 9  # Titanic-style tabular feature count (X_train.shape[1])
    batch = 8

    x = jax.random.normal(kx, (batch, num_features), jnp.float32)
    w1, b1, w2, b2 = init_params(kp, num_features)

    fwd = jax.jit(hybrid_forward)

    # Small-batch check (single full-extent tile).
    out = jax.block_until_ready(fwd(x, w1, b1, w2, b2))
    ref = reference_forward(x, w1, b1, w2, b2)
    assert out.shape == (batch, 2)
    assert bool(jnp.allclose(jnp.sum(jnp.exp(out), axis=1), 1.0, atol=1e-5))
    rows = _non_borderline_rows(x, w1, b1)
    assert bool(jnp.allclose(out[rows], ref[rows], atol=1e-5, rtol=1e-5))

    # Larger batch: exercises grid > 1, lane-aligned tiles, and the ragged last block.
    x2 = jax.random.normal(jax.random.PRNGKey(1), (2500, num_features), jnp.float32)
    out2 = jax.block_until_ready(fwd(x2, w1, b1, w2, b2))
    ref2 = reference_forward(x2, w1, b1, w2, b2)
    rows2 = _non_borderline_rows(x2, w1, b1)
    assert out2.shape == (2500, 2)
    assert bool(jnp.mean(rows2) > 0.9)
    assert bool(jnp.allclose(out2[rows2], ref2[rows2], atol=1e-5, rtol=1e-5))

    print("KERNEL_OK")
</pallas_src>

<mosaic_0001>
module attributes {stable_mosaic.version = 11 : i64} {
  func.func @hybrid_kernel(%arg0: i32, %arg1: memref<9x8xf32, #tpu.memory_space<vmem>>, %arg2: memref<8x9xf32, #tpu.memory_space<vmem>>, %arg3: memref<8x1xf32, #tpu.memory_space<vmem>>, %arg4: memref<1x8xf32, #tpu.memory_space<vmem>>, %arg5: memref<1x1xf32, #tpu.memory_space<smem>>, %arg6: memref<2x8xf32, #tpu.memory_space<vmem>>) attributes {dimension_semantics = [#tpu.dimension_semantics<parallel>], iteration_bounds = array<i64: 1>, scalar_prefetch = 0 : i64, scratch_operands = 0 : i64, tpu.core_type = #tpu.core_type<tc>, window_params = [{transform_indices = @transform_0, window_bounds = array<i64: 9, 8>}, {pipeline_mode = #tpu.pipeline_mode<synchronous>, transform_indices = @transform_1, window_bounds = array<i64: 8, 9>}, {pipeline_mode = #tpu.pipeline_mode<synchronous>, transform_indices = @transform_2, window_bounds = array<i64: 8, 1>}, {pipeline_mode = #tpu.pipeline_mode<synchronous>, transform_indices = @transform_3, window_bounds = array<i64: 1, 8>}, {transform_indices = @transform_4, window_bounds = array<i64: 1, 1>}, {transform_indices = @transform_5, window_bounds = array<i64: 2, 8>}]} {
    %c0 = arith.constant 0 : index
    %c0_0 = arith.constant 0 : index
    %0 = vector.load %arg2[%c0, %c0_0] : memref<8x9xf32, #tpu.memory_space<vmem>>, vector<8x9xf32>
    %c0_1 = arith.constant 0 : index
    %c0_2 = arith.constant 0 : index
    %1 = vector.load %arg1[%c0_1, %c0_2] : memref<9x8xf32, #tpu.memory_space<vmem>>, vector<9x8xf32>
    %cst = arith.constant dense<0.000000e+00> : vector<8x8xf32>
    %2 = tpu.matmul %0, %1, %cst {dimension_numbers = #tpu.dot_dimension_numbers<[1], [0], [0], [1], [0, 0, 1, 1], [], []>} : vector<8x9xf32>, vector<9x8xf32>, vector<8x8xf32> -> vector<8x8xf32>
    %c0_3 = arith.constant 0 : index
    %c0_4 = arith.constant 0 : index
    %3 = vector.load %arg3[%c0_3, %c0_4] : memref<8x1xf32, #tpu.memory_space<vmem>>, vector<8x1xf32>
    %4 = vector.broadcast %3 : vector<8x1xf32> to vector<8x8xf32>
    %5 = arith.addf %2, %4 : vector<8x8xf32>
    %cst_5 = arith.constant 0.000000e+00 : f32
    %6 = vector.broadcast %cst_5 : f32 to vector<8x8xf32>
    %7 = arith.maximumf %5, %6 : vector<8x8xf32>
    %8 = math.cos %7 : vector<8x8xf32>
    %cst_6 = arith.constant 0.000000e+00 : f32
    %9 = vector.broadcast %cst_6 : f32 to vector<8x8xf32>
    %10 = arith.cmpf olt, %8, %9 : vector<8x8xf32>
    %cst_7 = arith.constant 1.000000e+00 : f32
    %cst_8 = arith.constant -1.000000e+00 : f32
    %11 = vector.broadcast %cst_7 : f32 to vector<8x8xf32>
    %12 = vector.broadcast %cst_8 : f32 to vector<8x8xf32>
    %13 = arith.select %10, %11, %12 : vector<8x8xi1>, vector<8x8xf32>
    %c0_9 = arith.constant 0 : index
    %c0_10 = arith.constant 0 : index
    %14 = vector.load %arg4[%c0_9, %c0_10] : memref<1x8xf32, #tpu.memory_space<vmem>>, vector<1x8xf32>
    %cst_11 = arith.constant dense<0.000000e+00> : vector<1x8xf32>
    %15 = tpu.matmul %14, %13, %cst_11 {dimension_numbers = #tpu.dot_dimension_numbers<[1], [0], [0], [1], [0, 0, 1, 1], [], []>} : vector<1x8xf32>, vector<8x8xf32>, vector<1x8xf32> -> vector<1x8xf32>
    %c0_12 = arith.constant 0 : index
    %c0_13 = arith.constant 0 : index
    %16 = memref.load %arg5[%c0_12, %c0_13] : memref<1x1xf32, #tpu.memory_space<smem>>
    %17 = vector.broadcast %16 : f32 to vector<1x8xf32>
    %18 = arith.addf %15, %17 : vector<1x8xf32>
    %cst_14 = arith.constant 0.000000e+00 : f32
    %19 = vector.broadcast %cst_14 : f32 to vector<1x8xf32>
    %20 = arith.maximumf %18, %19 : vector<1x8xf32>
    %21 = math.absf %18 : vector<1x8xf32>
    %cst_15 = arith.constant 0.000000e+00 : f32
    %22 = vector.broadcast %cst_15 : f32 to vector<1x8xf32>
    %23 = arith.subf %22, %21 : vector<1x8xf32>
    %24 = math.exp %23 : vector<1x8xf32>
    %25 = math.log1p %24 : vector<1x8xf32>
    %26 = arith.addf %20, %25 : vector<1x8xf32>
    %cst_16 = arith.constant 0.000000e+00 : f32
    %27 = vector.broadcast %cst_16 : f32 to vector<1x8xf32>
    %28 = arith.subf %27, %26 : vector<1x8xf32>
    %c0_17 = arith.constant 0 : index
    %c0_18 = arith.constant 0 : index
    %29 = vector.load %arg6[%c0_17, %c0_18] : memref<2x8xf32, #tpu.memory_space<vmem>>, vector<1x8xf32>
    tpu.vector_store %arg6[%c0_17, %c0_18], %28 {strides = array<i32>} : memref<2x8xf32, #tpu.memory_space<vmem>>, vector<1x8xf32>,
    %30 = arith.subf %18, %26 : vector<1x8xf32>
    %c1 = arith.constant 1 : index
    %c0_19 = arith.constant 0 : index
    %31 = vector.load %arg6[%c1, %c0_19] : memref<2x8xf32, #tpu.memory_space<vmem>>, vector<1x8xf32>
    tpu.vector_store %arg6[%c1, %c0_19], %30 {strides = array<i32>} : memref<2x8xf32, #tpu.memory_space<vmem>>, vector<1x8xf32>,
    return
  }
  func.func @transform_0(%arg0: i32) -> (i32, i32) {
    %c0_i32 = arith.constant 0 : i32
    %c0_i32_0 = arith.constant 0 : i32
    return %c0_i32, %arg0 : i32, i32
  }
  func.func @transform_1(%arg0: i32) -> (i32, i32) {
    %c0_i32 = arith.constant 0 : i32
    %c0_i32_0 = arith.constant 0 : i32
    %c0_i32_1 = arith.constant 0 : i32
    return %c0_i32, %c0_i32_0 : i32, i32
  }
  func.func @transform_2(%arg0: i32) -> (i32, i32) {
    %c0_i32 = arith.constant 0 : i32
    %c0_i32_0 = arith.constant 0 : i32
    %c0_i32_1 = arith.constant 0 : i32
    return %c0_i32, %c0_i32_0 : i32, i32
  }
  func.func @transform_3(%arg0: i32) -> (i32, i32) {
    %c0_i32 = arith.constant 0 : i32
    %c0_i32_0 = arith.constant 0 : i32
    %c0_i32_1 = arith.constant 0 : i32
    return %c0_i32, %c0_i32_0 : i32, i32
  }
  func.func @transform_4(%arg0: i32) -> (i32, i32) {
    %c0_i32 = arith.constant 0 : i32
    %c0_i32_0 = arith.constant 0 : i32
    %c0_i32_1 = arith.constant 0 : i32
    return %c0_i32, %c0_i32_0 : i32, i32
  }
  func.func @transform_5(%arg0: i32) -> (i32, i32) {
    %c0_i32 = arith.constant 0 : i32
    %c0_i32_0 = arith.constant 0 : i32
    return %c0_i32, %arg0 : i32, i32
  }
}

</mosaic_0001>

<bundles_post_ra>
// kernel: hybrid_forward.2
= control target key start
LH: loop header
LB: loop body
LE: loop exit
PB: predicated region body
PF: predicated region fallthrough
CT: control target
= control target key end

     0   :  { %v413_v2 = vmov 0.0|0.0   ;;  %vm414_vm0 = vmmov 0   ;;  %v415_v4 = vmov 0.0   ;;  %v416_v5 = vmov 0   ;;  %s507_s0 = inlined_call_operand.vmem [shape: f32[8,9], index: 0, kind: input, shape index: {}]   ;;  %s508_s1 = inlined_call_operand.vmem [shape: f32[8,1], index: 1, kind: input, shape index: {}]   ;;  %s509_s2 = inlined_call_operand.vmem [shape: f32[1,8], index: 2, kind: input, shape index: {}]   ;;  %s510_s3 = inlined_call_operand.<no memory space> [shape: f32[1,1], index: 3, kind: input, shape index: {}]   ;;  %s511_s4 = inlined_call_operand.vmem [shape: f32[8,9], index: 4, kind: input, shape index: {}]   ;;  %s512_s5 = inlined_call_operand.hbm [shape: f32[2,8], index: 5, kind: output, shape index: {}]  }
   0x1   :  { %v22_v0 = vld [vmem:[%s511_s4] sm:$0xff]  ;;  %v334_v1 = vld [vmem:[%s511_s4 + $0x8] sm:$0xff]  ;;  %359 = vmatprep.subr.bf16.mxu0 %v413_v2  ;;  %351 = vmatprep.mubr.msk.f32.mxu0 %vm414_vm0, %v415_v4 }
   0x2   :  { %29 = vst [vmem:[#allocation5 + $0x8] sm:$0xff] %v334_v1  ;;  %v33_v3 = vld [vmem:[%s508_s1] sm:$0xff]  ;;  %380 = vset.pattern.permute.xlu0 %v416_v5 }
   0x3   :  { %11 = vsyncpa [#allocation4], 0  ;;  %36 = vperm.xlu0 %380, %v33_v3   ;;  %354 = vmatprep.subr.mxu1 %v415_v4  ;;  %vm43_vm1 = vcmask 1040384   ;;  %vm417_vm2 = vmmov 1   ;;  %v30_v8 = vld [vmem:[%s507_s0] sm:$0xff]  ;;  %vm39_vm4 = vcmask 72704  }
   0x4   :  { %356 = vmatprep.mubr.msk.f32.mxu1 %vm414_vm0, %v415_v4  ;;  %vm361_vm3 = vmpackc.low %vm43_vm1, %vm417_vm2  ;;  %v418_v25 = vmov 2102212464   ;;  %v419_v27 = vmov 920167782   ;;  %v420_v31 = vmov 1326507024  }
   0x5   :  { %v421_v33 = vmov 683565275   ;;  %v422_v35 = vmov 2475754826   ;;  %v423_v38 = vmov 2131351028  }
   0x9   :  { %v32_v6 = vld [vmem:[#allocation5 + $0x8] sm:$0x1] }
   0xa   :  { %v360_v7 = vpack.c.bf16 %v32_v6, %v22_v0 }
   0xc   :  { %362 = vmatpush3.bf16.msk.msra.mxu0 %vm361_vm3, %v360_v7  ;;  %vm226_vm3 = vcmask 64512  }
   0xf   :  { %352 = vmatmul.mubr.msk.f32.vlgmr.msra.gmra.mrb[0].mxu0 %vm39_vm4, %v30_v8 }
  0x82   :  { %v37_v9 = vpop.permute.xlu0 %36 }
  0xe2   :  { %v113_v10 = vpop.f32.mrb[0].mxu0 }
  0xe3   :  { %v114_v11 = vadd.f32 %v113_v10, %v37_v9  ;;  %v353_v12 = vpop.f32.mrb[1].mxu0 }
  0xe5   :  { %v468_v13 = vmax.f32 %v114_v11, 0.0 }
  0xe7   :  { %v121_v14 = vand.u32 2139095040, %v468_v13  ;;  %v118_v15 = vand.u32 2147483647, %v468_v13  ;;  %vm120_vm12 = vcmp.lt.s32.totalorder %v468_v13, 0  ;;  %vm210_vm1 = vweird.f32 %v468_v13 }
  0xe9   :  { %v122_v16 = vshrl.u32 %v121_v14, 23  ;;  %v125_v18 = vand.u32 8388607, %v118_v15  ;;  %vm119_vm13 = vcmp.le.f32.partialorder %v118_v15, 0.7853982 }
  0xeb   :  { %v337_v17 = vadd.s32 4294967169, %v122_v16  ;;  %v126_v21 = vor.u32 8388608, %v125_v18 }
  0xed   :  { %v128_v19 = vadd.s32 1, %v337_v17  ;;  %v166_v29 = vshll.u32 %v126_v21, 8 }
  0xef   :  { %vm129_vm5 = vcmp.gt.s32.totalorder %v128_v19, 0 }
  0xf0   :  { %v130_v20 = vsel %vm129_vm5, %v128_v19, 0  ;;  %vm316_vm5 = vcmask 57344  }
  0xf1   :  { %v132_v22 = vand.u32 31, %v130_v20  ;;  %v131_v23 = vshrl.u32 %v130_v20, 5 }
  0xf3   :  { %v133_v24 = vsub.s32 32, %v132_v22  ;;  %v144_v26 = vshll.u32 %v418_v25, %v132_v22  ;;  %v147_v28 = vshll.u32 %v419_v27, %v132_v22  ;;  %v135_v34 = vshll.u32 %v421_v33, %v132_v22 }
  0xf4   :  { %v138_v37 = vshll.u32 %v422_v35, %v132_v22  ;;  %v141_v40 = vshll.u32 %v423_v38, %v132_v22  ;;  %vm153_vm6 = vcmp.lt.s32.totalorder %v131_v23, 4  ;;  %vm150_vm7 = vcmp.lt.s32.totalorder %v131_v23, 1 }
  0xf5   :  { %v145_v30 = vshrl.u32 %v419_v27, %v133_v24  ;;  %v148_v32 = vshrl.u32 %v420_v31, %v133_v24  ;;  %v136_v36 = vshrl.u32 %v422_v35, %v133_v24  ;;  %v139_v39 = vshrl.u32 %v423_v38, %v133_v24 }
  0xf6   :  { %v142_v41 = vshrl.u32 %v418_v25, %v133_v24  ;;  %v134_v45 = vshrl.u32 %v421_v33, %v133_v24  ;;  %vm151_vm8 = vcmp.lt.s32.totalorder %v131_v23, 2  ;;  %vm152_vm9 = vcmp.lt.s32.totalorder %v131_v23, 3 }
  0xf7   :  { %v146_v42 = vor.u32 %v145_v30, %v144_v26  ;;  %v149_v43 = vor.u32 %v148_v32, %v147_v28  ;;  %v137_v44 = vor.u32 %v136_v36, %v135_v34  ;;  %v140_v46 = vor.u32 %v139_v39, %v138_v37 }
  0xf8   :  { %v143_v47 = vor.u32 %v142_v41, %v141_v40  ;;  %v223_v41 = vld [vmem:[%s509_s2] sm:$0x1]  ;;  %s425_s2 = smov [#allocation3]  }
  0xf9   :  { %v159_v48 = vsel %vm153_vm6, %v146_v42, 920167782  ;;  %v163_v49 = vsel %vm153_vm6, %v149_v43, 1326507024  ;;  %v158_v51 = vsel %vm150_vm7, %v137_v44, %v140_v46  ;;  %v154_v54 = vsel %vm150_vm7, %v134_v45, %v137_v44 }
  0xfa   :  { %v155_v50 = vsel %vm153_vm6, %v143_v47, 2102212464  ;;  %v160_v52 = vsel %vm152_vm9, %v143_v47, %v159_v48  ;;  %v162_v53 = vsel %vm150_vm7, %v140_v46, %v143_v47  ;;  %v164_v57 = vsel %vm152_vm9, %v146_v42, %v163_v49 }
  0xfb   :  { %v156_v55 = vsel %vm152_vm9, %v140_v46, %v155_v50  ;;  %v161_v56 = vsel %vm151_vm8, %v158_v51, %v160_v52  ;;  %v165_v58 = vsel %vm151_vm8, %v162_v53, %v164_v57  ;;  %v424_v42 = vmov -1.0  }
  0xfc   :  { %v474_v59 = vmul.u32.u64.low %v166_v29, %v161_v56  ;;  %v475_v60 = vmul.u32.u64.high %v166_v29, %v161_v56, %v474_v59  ;;  %v477_v61 = vmul.u32.u64.low %v166_v29, %v165_v58  ;;  %v478_v62 = vmul.u32.u64.high %v166_v29, %v165_v58, %v477_v61 }
  0xfd   :  { %v157_v63 = vsel %vm151_vm8, %v154_v54, %v156_v55  ;;  %v225_v44 = vstv %s510_s3  ;;  %s326_s3 = sshll.u32 %s425_s2, 4  ;;  %s327_s3 = int_to_ptr.vmem [resolvable:$true] %s326_s3 }
  0xfe   :  { %v176_v0 = vadd.s32 1, %v475_v60  ;;  %v173_v1 = vmul.u32 %v166_v29, %v157_v63  ;;  %vm175_vm10 = vc.u32 %v478_v62, %v474_v59  ;;  %v174_v14 = vadd.s32 %v474_v59, %v478_v62  ;;  %s389_s27 = scalar_lea.vmem %s327_s3, 32  ;;  %p394_p1 = scmp.lt.s32.totalorder %s327_s3, %s327_s3 }
  0xff   :  { %p390_p0 = scmp.ne.s32.totalorder %s327_s3, %s389_s27  ;;  %p395_p2 = scmp.lt.s32.totalorder %s389_s27, %s389_s27 }
 0x100   :  { %v177_v2 = vsel %vm175_vm10, %v176_v0, %v475_v60 }
 0x101   :  { %v178_v3 = vadd.s32 %v177_v2, %v173_v1  ;;  %p396_p3 = por %p395_p2, %p394_p1 }
 0x103   :  { %v179_v4 = vadd.s32 536870912, %v178_v3  ;;  %p397_p4 = pnand %p396_p3, %p390_p0 }
 0x105   :  { %v180_v5 = vshrl.u32 %v179_v4, 30 }
 0x107   :  { %v181_v6 = vshll.u32 %v180_v5, 30  ;;  %v204_v29 = vsub.s32 4, %v180_v5 }
 0x109   :  { %v182_v7 = vsub.s32 %v178_v3, %v181_v6  ;;  %v205_v31 = vsel %vm120_vm12, %v204_v29, %v180_v5 }
 0x10a   :  { %v207_v32 = vsel %vm119_vm13, 0, %v205_v31 }
 0x10b   :  { %v184_v8 = vsub.s32 0, %v182_v7  ;;  %v211_v33 = vand.u32 3, %v207_v32 }
 0x10d   :  { %v338_v9 = vmin.u32 %v184_v8, %v182_v7  ;;  %vm216_vm14 = vcmp.eq.s32.totalorder %v211_v33, 2  ;;  %vm213_vm15 = vcmp.eq.s32.totalorder %v211_v33, 0  ;;  %vm212_vm0 = vcmp.lt.s32.totalorder %v211_v33, 2 }
 0x10f   :  { %v186_v10 = vclz %v338_v9 }
 0x111   :  { %v339_v11 = vadd.s32 4294967294, %v186_v10 }
 0x113   :  { %vm340_vm11 = vcmp.lt.s32.totalorder %v339_v11, 0 }
 0x114   :  { %v189_v12 = vsel %vm340_vm11, 0, %v339_v11 }
 0x115   :  { %v190_v16 = vsub.s32 32, %v189_v12  ;;  %v194_v17 = vsub.s32 4294967266, %v189_v12  ;;  %v191_v18 = vshll.u32 %v182_v7, %v189_v12 }
 0x117   :  { %v192_v19 = vshrl.u32 %v174_v14, %v190_v16  ;;  %v195_v20 = vadd.s32 127, %v194_v17 }
 0x119   :  { %v193_v21 = vor.u32 %v192_v19, %v191_v18  ;;  %v196_v22 = vshll.u32 %v195_v20, 23 }
 0x11b   :  { %v197_v23 = vor.u32 4788187, %v196_v22  ;;  %v200_v25 = vcvt.s32.f32 %v193_v21 }
 0x11d   :  { %v198_v24 = vand.u32 2147483647, %v197_v23 }
 0x11f   :  { %v201_v26 = vmul.f32 %v200_v25, %v198_v24 }
 0x121   :  { %v202_v27 = vxor.u32 2147483648, %v201_v26 }
 0x123   :  { %v203_v28 = vsel %vm120_vm12, %v202_v27, %v201_v26 }
 0x124   :  { %v206_v30 = vsel %vm119_vm13, %v468_v13, %v203_v28 }
 0x125   :  { %381 = vcosq.f32 %v206_v30 }
 0x126   :  { %383 = vsinq.f32 %v206_v30 }
 0x12f   :  { %v382_v34 = vpop.eup %381 }
 0x130   :  { %v384_v35 = vpop.eup %383  ;;  %v217_v36 = vxor.u32 2147483648, %v382_v34 }
 0x131   :  { %v214_v37 = vxor.u32 2147483648, %v384_v35 }
 0x132   :  { %v218_v38 = vsel %vm216_vm14, %v217_v36, %v384_v35 }
 0x133   :  { %v215_v39 = vsel %vm213_vm15, %v382_v34, %v214_v37 }
 0x134   :  { %v219_v15 = vsel %vm212_vm0, %v215_v39, %v218_v38 }
 0x135   :  { %v220_v40 = vsel %vm210_vm1, nan, %v219_v15 }
 0x136   :  { %vm221_vm2 = vcmp.lt.f32.partialorder %v220_v40, 0.0 }
 0x137   :  { %v222_v43 = vsel %vm221_vm2, 1.0, %v424_v42 }
 0x138   :  { %355 = vmatpush3.msra.mxu1 %v222_v43 }
 0x139   :  { %357 = vmatmul.mubr.msk.f32.vlgmr.msra.gmra.mrb[0].mxu1 %vm226_vm3, %v223_v41 }
 0x20c   :  { %v296_v45 = vpop.f32.mrb[0].mxu1 }
 0x20d   :  { %v297_v46 = vadd.f32 %v296_v45, %v225_v44  ;;  %v358_v47 = vpop.f32.mrb[1].mxu1 }
 0x20f   :  { %v301_v13 = vand.u32 2147483647, %v297_v46  ;;  %v300_v58 = vmax.f32 %v297_v46, 0.0 }
 0x211   :  { %v302_v48 = vsub.f32 0.0, %v301_v13 }
 0x213   :  { %v303_v49 = vmul.f32 1.442695, %v302_v48 }
 0x215   :  { %385 = vpow2.f32 %v303_v49 }
 0x21f   :  { %v386_v50 = vpop.eup %385 }
 0x220   :  { %v305_v51 = vadd.f32 1.0, %v386_v50  ;;  %v308_v52 = vmul.f32 -0.5, %v386_v50  ;;  %v311_v54 = vand.u32 2147483647, %v386_v50 }
 0x222   :  { %387 = vlog2.f32 %v305_v51  ;;  %v309_v53 = vadd.f32 1.0, %v308_v52  ;;  %vm312_vm4 = vcmp.lt.f32.partialorder %v311_v54, 0.0004427343 }
 0x224   :  { %v310_v57 = vmul.f32 %v386_v50, %v309_v53 }
 0x22c   :  { %v388_v55 = vpop.eup %387 }
 0x22d   :  { %v307_v56 = vmul.f32 0.6931472, %v388_v55 }
 0x22f   :  { %v313_v59 = vsel %vm312_vm4, %v310_v57, %v307_v56 }
 0x230   :  { %v314_v60 = vadd.f32 %v313_v59, %v300_v58 }
 0x232   :  { %v318_v61 = vsub.f32 %v297_v46, %v314_v60  ;;  %v315_v62 = vsub.f32 0.0, %v314_v60 }
 0x234   :  { %317 = vst.msk [vmem:[#allocation3] sm:$0x1] %vm316_vm5, %v315_v62  ;;  %319 = vst.msk [vmem:[#allocation3 + $0x1] sm:$0x1] %vm316_vm5, %v318_v61 }
 0x235   :  { %400 = shalt.err (!%p397_p4)
}
 0x236   :  { %s401_s30 = scalar_lea.hbm %s512_s5, 32 }
 0x237   :  { %p402_p5 = scmp.ne.s32.totalorder %s512_s5, %s401_s30  ;;  %p405_p6 = scmp.lt.u32.totalorder %s401_s30, %s512_s5 }
 0x239   :  { %p407_p7 = pnand %p405_p6, %p402_p5 }
 0x23b   :  { %410 = shalt.err (!%p407_p7)
}
 0x23c   :  { %329 = dma.vmem_to_hbm [thread:$0]  %s327_s3, 32, %s512_s5, [#allocation4]  }
 0x23d   :  { %411 = dma.done.wait [#allocation4], 32  }
 0x23e   :  { %412 = vsyncadd [#allocation4], 4294967264 }
 0x23f   :  { %333 = vsyncpa [#allocation4], 1 }

</bundles_post_ra>
